<compile_context>
chip_gen: v5e
topology: v5e:2x2
jax: 0.10.0
libtpu: 0.0.40
codegen_flags: <defaults>
</compile_context>

<pallas_src>
import math

import jax
import jax.numpy as jnp
from jax.experimental import pallas as pl
from jax.experimental.pallas import tpu as pltpu


# ----------------------------- PE table (buffer) -----------------------------

def make_fixed_pe(max_len, d_model, scale_factor=1.0):
    """Same math as the PyTorch register_buffer; returned as (max_len, 1, d_model) f32."""
    position = jnp.arange(max_len, dtype=jnp.float32)[:, None]
    div_term = jnp.exp(jnp.arange(0, d_model, 2, dtype=jnp.float32)
                       * (-math.log(10000.0) / d_model))
    pe = jnp.zeros((max_len, d_model), jnp.float32)
    pe = pe.at[:, 0::2].set(jnp.sin(position * div_term))
    pe = pe.at[:, 1::2].set(jnp.cos(position * div_term))
    return (scale_factor * pe)[:, None, :]           # (max_len, 1, d_model)


# ------------------------------- Pallas kernel --------------------------------

def _add_pe_kernel(x_ref, pe_ref, o_ref):
    # x: (ts, B, D); pe: (ts, D).  Broadcast PE over the batch (sublane) axis in VMEM
    # and cast the sum explicitly to the output dtype.
    o_ref[...] = (x_ref[...] + pe_ref[...][:, None, :]).astype(o_ref.dtype)


# ------------------------------ tile selection ---------------------------------

_VMEM_BUDGET = 48 << 20    # per-TC pipeline budget: safe on v7x (64 MiB), ample on v5e/v6e
_TARGET_X_BLOCK = 4 << 20  # ~MiB-scale x blocks reach 85%+ of the HBM roofline


def _sanitize_tile(ts, S):
    """Tile must be full-extent or a multiple of 8 (PE block's sublane dim)."""
    ts = int(min(ts, S))
    if ts >= S:
        return S
    return max(8, (ts // 8) * 8)


def _pick_seq_tile(S, B, D, dtype_bytes):
    x_row = max(1, B * D * dtype_bytes)               # one sequence position of x
    pe_row = max(1, D * dtype_bytes)
    per_row = 4 * x_row + 2 * pe_row                  # double-buffered x-in + out + pe
    ts = min(_TARGET_X_BLOCK // x_row, _VMEM_BUDGET // per_row)
    return _sanitize_tile(max(ts, 8), S)


def _vmem_limit_bytes(ts, B, D, dtype_bytes):
    x_blk = ts * B * D * dtype_bytes
    pe_blk = ts * D * dtype_bytes
    need = 4 * x_blk + 2 * pe_blk + (2 << 20)         # pipeline buffers + headroom
    return int(min(max(need, 16 << 20), 60 << 20))


# --------------------------------- wrapper -------------------------------------

def fixed_positional_encoding(x, pe, *, seq_tile=None):
    """x: (S, B, D); pe: (max_len, 1, D) or (max_len, D).  Returns x + pe[:S]."""
    S, B, D = x.shape
    dtype_bytes = jnp.dtype(x.dtype).itemsize

    # Compact 2-D, dtype-matched PE slice (sublane-dense, half traffic for bf16 x).
    pe_2d = pe if pe.ndim == 2 else pe.reshape(pe.shape[0], pe.shape[-1])
    pe_s = pe_2d[:S].astype(x.dtype)                  # (S, D)

    ts = _sanitize_tile(seq_tile, S) if seq_tile else _pick_seq_tile(S, B, D, dtype_bytes)

    return pl.pallas_call(
        _add_pe_kernel,
        out_shape=jax.ShapeDtypeStruct((S, B, D), x.dtype),
        grid=(pl.cdiv(S, ts),),                       # ragged tail block is masked by Pallas
        in_specs=[pl.BlockSpec((ts, B, D), lambda i: (i, 0, 0)),
                  pl.BlockSpec((ts, D), lambda i: (i, 0))],
        out_specs=pl.BlockSpec((ts, B, D), lambda i: (i, 0, 0)),
        compiler_params=pltpu.CompilerParams(
            dimension_semantics=("parallel",),
            vmem_limit_bytes=_vmem_limit_bytes(ts, B, D, dtype_bytes)),
    )(x, pe_s)
    # TODO(synk): nn.Dropout(p=0.1) is identity in eval mode; training-mode dropout
    # (pltpu.prng_random_bits mask) is intentionally not applied here.


# ----------------------------------- main -------------------------------------

if __name__ == "__main__":
    key = jax.random.PRNGKey(0)

    # Small shapes consistent with the module: x is [seq_len, batch, d_model].
    seq_len, batch, d_model, max_len = 8, 2, 32, 16
    x = jax.random.normal(key, (seq_len, batch, d_model), jnp.float32)
    pe = make_fixed_pe(max_len, d_model)              # built once, like register_buffer

    out = jax.block_until_ready(fixed_positional_encoding(x, pe))
    ref = x + pe[:seq_len]
    assert out.shape == (seq_len, batch, d_model), out.shape
    assert bool(jnp.all(jnp.isfinite(out)))
    assert bool(jnp.allclose(out, ref, atol=1e-6, rtol=1e-6))

    # Ragged-tail path: seq_tile does not divide S; grid = cdiv(S, ts) masks the tail block.
    s2 = 13
    x2 = jax.random.normal(jax.random.PRNGKey(1), (s2, batch, d_model), jnp.float32)
    out2 = jax.block_until_ready(fixed_positional_encoding(x2, pe, seq_tile=8))
    ref2 = x2 + pe[:s2]
    assert bool(jnp.allclose(out2, ref2, atol=1e-6, rtol=1e-6))

    print("KERNEL_OK")
</pallas_src>

<mosaic_0001>
module attributes {stable_mosaic.version = 11 : i64} {
  func.func @_add_pe_kernel(%arg0: i32, %arg1: memref<8x2x32xf32, #tpu.memory_space<vmem>>, %arg2: memref<8x32xf32, #tpu.memory_space<vmem>>, %arg3: memref<8x2x32xf32, #tpu.memory_space<vmem>>) attributes {dimension_semantics = [#tpu.dimension_semantics<parallel>], iteration_bounds = array<i64: 1>, scalar_prefetch = 0 : i64, scratch_operands = 0 : i64, tpu.core_type = #tpu.core_type<tc>, window_params = [{transform_indices = @transform_0, window_bounds = array<i64: 8, 2, 32>}, {transform_indices = @transform_1, window_bounds = array<i64: 8, 32>}, {transform_indices = @transform_2, window_bounds = array<i64: 8, 2, 32>}]} {
    %c0 = arith.constant 0 : index
    %c0_0 = arith.constant 0 : index
    %c0_1 = arith.constant 0 : index
    %0 = vector.load %arg1[%c0, %c0_0, %c0_1] : memref<8x2x32xf32, #tpu.memory_space<vmem>>, vector<8x2x32xf32>
    %c0_2 = arith.constant 0 : index
    %c0_3 = arith.constant 0 : index
    %1 = vector.load %arg2[%c0_2, %c0_3] : memref<8x32xf32, #tpu.memory_space<vmem>>, vector<8x32xf32>
    %2 = vector.shape_cast %1 : vector<8x32xf32> to vector<8x1x32xf32>
    %3 = vector.broadcast %2 : vector<8x1x32xf32> to vector<8x2x32xf32>
    %4 = arith.addf %0, %3 : vector<8x2x32xf32>
    %c0_4 = arith.constant 0 : index
    %c0_5 = arith.constant 0 : index
    %c0_6 = arith.constant 0 : index
    %5 = vector.load %arg3[%c0_4, %c0_5, %c0_6] : memref<8x2x32xf32, #tpu.memory_space<vmem>>, vector<8x2x32xf32>
    tpu.vector_store %arg3[%c0_4, %c0_5, %c0_6], %4 {strides = array<i32>} : memref<8x2x32xf32, #tpu.memory_space<vmem>>, vector<8x2x32xf32>,
    return
  }
  func.func @transform_0(%arg0: i32) -> (i32, i32, i32) {
    %c0_i32 = arith.constant 0 : i32
    %c0_i32_0 = arith.constant 0 : i32
    %c0_i32_1 = arith.constant 0 : i32
    return %arg0, %c0_i32, %c0_i32_0 : i32, i32, i32
  }
  func.func @transform_1(%arg0: i32) -> (i32, i32) {
    %c0_i32 = arith.constant 0 : i32
    %c0_i32_0 = arith.constant 0 : i32
    return %arg0, %c0_i32 : i32, i32
  }
  func.func @transform_2(%arg0: i32) -> (i32, i32, i32) {
    %c0_i32 = arith.constant 0 : i32
    %c0_i32_0 = arith.constant 0 : i32
    %c0_i32_1 = arith.constant 0 : i32
    return %arg0, %c0_i32, %c0_i32_0 : i32, i32, i32
  }
}

</mosaic_0001>

<bundles_post_ra>
// kernel: tpu_custom_call.1
= control target key start
LH: loop header
LB: loop body
LE: loop exit
PB: predicated region body
PF: predicated region fallthrough
CT: control target
= control target key end

     0   :  { %7 = vsyncpa [#allocation3], 0  ;;  %s238_s0 = inlined_call_operand.hbm [shape: f32[8,2,32], index: 0, kind: input, shape index: {}]   ;;  %s239_s1 = inlined_call_operand.hbm [shape: f32[8,32], index: 1, kind: input, shape index: {}]   ;;  %s240_s2 = inlined_call_operand.hbm [shape: f32[8,2,32], index: 2, kind: output, shape index: {}]  }
   0x1   :  { %8 = vsyncpa [#allocation6], 0 }
   0x2   :  { %9 = vsyncpa [#allocation4], 0  ;;  %s14_s11 = sshll.u32 %s238_s0, 4  ;;  %s195_s12 = smov [#allocation2]   ;;  %s15_s11 = int_to_ptr.hbm [resolvable:$true] %s14_s11 }
   0x3   :  { %s16_s13 = sshll.u32 %s195_s12, 4  ;;  %s28_s16 = sshll.u32 %s239_s1, 4  ;;  %s17_s13 = int_to_ptr.vmem [resolvable:$true] %s16_s13  ;;  %s29_s16 = int_to_ptr.hbm [resolvable:$true] %s28_s16 }
   0x4   :  { %s196_s17 = smov 32   ;;  %s197_s18 = smov 2  }
   0x5   :  { %22 = dma.hbm_to_vmem [thread:$0]  %s15_s11, 256, %s17_s13, [#allocation3], %s196_s17, %s196_s17, %s197_s18  }
   0x6   :  { %s198_s19 = smov [#allocation5]  }
   0x7   :  { %s30_s20 = sshll.u32 %s198_s19, 4  ;;  %s31_s20 = int_to_ptr.vmem [resolvable:$true] %s30_s20 }
   0x8   :  { %33 = dma.hbm_to_vmem [thread:$0]  %s29_s16, 128, %s31_s20, [#allocation6]  }
   0x9   :  { %189 = dma.done.wait [#allocation3], 256  }
   0xa   :  { %190 = vsyncadd [#allocation3], 4294967040 }
   0xb   :  { %191 = dma.done.wait [#allocation6], 128  }
   0xc   :  { %192 = vsyncadd [#allocation6], 4294967168  ;;  %v42_v0 = vld [vmem:[#allocation2] sm:$0x3]  ;;  %v50_v1 = vld [vmem:[#allocation5] sm:$0xff]  ;;  %vm83_vm0 = vcmask 254976  }
   0xd   :  { %v59_v2 = vperm.slane %v50_v1, 0  ;;  %v43_v3 = vld [vmem:[#allocation2 + $0x2] sm:$0x3]  ;;  %v52_v4 = vrot.slane %v50_v1, 1  ;;  %v53_v5 = vrot.slane %v50_v1, 2  ;;  %v54_v6 = vrot.slane %v50_v1, 3 }
   0xe   :  { %v44_v7 = vld [vmem:[#allocation2 + $0x4] sm:$0x3]  ;;  %v45_v8 = vld [vmem:[#allocation2 + $0x6] sm:$0x3]  ;;  %v55_v9 = vrot.slane %v50_v1, 4  ;;  %v56_v10 = vrot.slane %v50_v1, 5 }
   0xf   :  { %v75_v11 = vadd.f32 %v59_v2, %v42_v0  ;;  %v60_v12 = vperm.slane %v52_v4, 0  ;;  %v61_v13 = vperm.slane %v53_v5, 0  ;;  %v62_v14 = vperm.slane %v54_v6, 0  ;;  %v46_v15 = vld [vmem:[#allocation2 + $0x8] sm:$0x3]  ;;  %s199_s0 = smov [#allocation7]  }
  0x10   :  { %v63_v16 = vperm.slane %v55_v9, 0  ;;  %v47_v17 = vld [vmem:[#allocation2 + $0xa] sm:$0x3]  ;;  %v64_v18 = vperm.slane %v56_v10, 0  ;;  %v57_v19 = vrot.slane %v50_v1, 6  ;;  %v58_v20 = vrot.slane %v50_v1, 7 }
  0x11   :  { %84 = vst.msk [vmem:[#allocation7] sm:$0x3] %vm83_vm0, %v75_v11  ;;  %v76_v21 = vadd.f32 %v60_v12, %v43_v3  ;;  %v77_v22 = vadd.f32 %v61_v13, %v44_v7  ;;  %v78_v23 = vadd.f32 %v62_v14, %v45_v8  ;;  %v48_v24 = vld [vmem:[#allocation2 + $0xc] sm:$0x3]  ;;  %v49_v27 = vld [vmem:[#allocation2 + $0xe] sm:$0x3] }
  0x12   :  { %v79_v25 = vadd.f32 %v63_v16, %v46_v15  ;;  %v65_v26 = vperm.slane %v57_v19, 0  ;;  %v66_v28 = vperm.slane %v58_v20, 0  ;;  %v80_v29 = vadd.f32 %v64_v18, %v47_v17  ;;  %s96_s1 = sshll.u32 %s199_s0, 4  ;;  %s98_s23 = sshll.u32 %s240_s2, 4  ;;  %s97_s1 = int_to_ptr.vmem [resolvable:$true] %s96_s1  ;;  %s99_s23 = int_to_ptr.hbm [resolvable:$true] %s98_s23 }
  0x13   :  { %85 = vst.msk [vmem:[#allocation7 + $0x2] sm:$0x3] %vm83_vm0, %v76_v21 }
  0x14   :  { %86 = vst.msk [vmem:[#allocation7 + $0x4] sm:$0x3] %vm83_vm0, %v77_v22  ;;  %v81_v30 = vadd.f32 %v65_v26, %v48_v24  ;;  %v82_v31 = vadd.f32 %v66_v28, %v49_v27 }
  0x15   :  { %87 = vst.msk [vmem:[#allocation7 + $0x6] sm:$0x3] %vm83_vm0, %v78_v23 }
  0x16   :  { %88 = vst.msk [vmem:[#allocation7 + $0x8] sm:$0x3] %vm83_vm0, %v79_v25 }
  0x17   :  { %89 = vst.msk [vmem:[#allocation7 + $0xa] sm:$0x3] %vm83_vm0, %v80_v29 }
  0x18   :  { %90 = vst.msk [vmem:[#allocation7 + $0xc] sm:$0x3] %vm83_vm0, %v81_v30 }
  0x19   :  { %91 = vst.msk [vmem:[#allocation7 + $0xe] sm:$0x3] %vm83_vm0, %v82_v31 }
  0x1a   :  { %104 = dma.vmem_to_hbm [thread:$0]  %s97_s1, 256, %s99_s23, [#allocation4], %s196_s17, %s196_s17, %s197_s18  }
  0x1b   :  { %193 = dma.done.wait [#allocation4], 256  }
  0x1c   :  { %194 = vsyncadd [#allocation4], 4294967040 }
  0x1d   :  { %109 = vsyncpa [#allocation3], 1 }
  0x1e   :  { %110 = vsyncpa [#allocation6], 1 }
  0x1f   :  { %111 = vsyncpa [#allocation4], 1 }

</bundles_post_ra>
